<compile_context>
chip_gen: v7x
topology: tpu7x:2x2x1
jax: 0.10.0
libtpu: 0.0.40
codegen_flags: <defaults>
</compile_context>

<pallas_src>
import functools
import math

import jax
import jax.numpy as jnp
from jax.experimental import pallas as pl
from jax.experimental.pallas import tpu as pltpu


_VMEM_LIMIT = 48 * 1024 * 1024   # stays below v7x's 64 MiB physical VMEM


def _pick_block(dim, target, align):
    """Largest `align`-multiple <= target that divides dim; dim itself if small."""
    if dim <= target:
        return dim
    best = None
    b = align
    while b <= target:
        if dim % b == 0:
            best = b
        b += align
    return best if best is not None else dim


# ----------------------------------------------------------------------------
# Dense (tiled matmul, bf16 MXU operands, f32 accumulation)
# ----------------------------------------------------------------------------

def _dense_kernel(x_ref, w_ref, b_ref, o_ref, acc_ref, *, activation):
    @pl.when(pl.program_id(2) == 0)
    def _():
        acc_ref[...] = jnp.zeros_like(acc_ref)

    acc_ref[...] += jnp.dot(
        x_ref[...].astype(jnp.bfloat16), w_ref[...],
        preferred_element_type=jnp.float32)

    @pl.when(pl.program_id(2) == pl.num_programs(2) - 1)
    def _():
        y = acc_ref[...] + b_ref[...]
        if activation == "gelu":
            # TODO(synk): HF BERT uses exact erf-based GELU; tanh approximation
            # is used here for Mosaic-safe lowering (EUP tanh), f32 math.
            c = math.sqrt(2.0 / math.pi)
            y = 0.5 * y * (1.0 + jnp.tanh(c * (y + 0.044715 * y * y * y)))
        elif activation == "tanh":
            y = jnp.tanh(y)
        o_ref[...] = y.astype(o_ref.dtype)


def dense(x, w, b, activation=None):
    """y = act(x @ w + b).  x: (M, K) f32, w: (K, N) bf16, b: (N,) f32."""
    M, K = x.shape
    N = w.shape[1]
    bm = _pick_block(M, 256, 8)
    bn = _pick_block(N, 512, 128)
    bk = _pick_block(K, 512, 128)
    grid = (M // bm, N // bn, K // bk)
    return pl.pallas_call(
        functools.partial(_dense_kernel, activation=activation),
        out_shape=jax.ShapeDtypeStruct((M, N), jnp.float32),
        grid=grid,
        in_specs=[
            pl.BlockSpec((bm, bk), lambda i, j, k: (i, k)),
            pl.BlockSpec((bk, bn), lambda i, j, k: (k, j)),
            pl.BlockSpec((1, bn), lambda i, j, k: (0, j)),
        ],
        out_specs=pl.BlockSpec((bm, bn), lambda i, j, k: (i, j)),
        scratch_shapes=[pltpu.VMEM((bm, bn), jnp.float32)],
        compiler_params=pltpu.CompilerParams(
            dimension_semantics=("parallel", "parallel", "arbitrary"),
            vmem_limit_bytes=_VMEM_LIMIT),
    )(x, w, b.reshape(1, N))


# ----------------------------------------------------------------------------
# LayerNorm (optionally fused with the residual add), f32 math
# ----------------------------------------------------------------------------

def _ln_math(x, g, b, eps):
    mean = jnp.mean(x, axis=-1, keepdims=True)
    cen = x - mean
    var = jnp.mean(cen * cen, axis=-1, keepdims=True)
    inv = jax.lax.rsqrt(var + eps)
    return cen * inv * g + b


def _ln_kernel(x_ref, g_ref, b_ref, o_ref, *, eps):
    o_ref[...] = _ln_math(x_ref[...], g_ref[...], b_ref[...],
                          eps).astype(o_ref.dtype)


def _add_ln_kernel(x_ref, r_ref, g_ref, b_ref, o_ref, *, eps):
    o_ref[...] = _ln_math(x_ref[...] + r_ref[...], g_ref[...], b_ref[...],
                          eps).astype(o_ref.dtype)


def layernorm(x, gamma, beta, residual=None, eps=1e-12):
    """LayerNorm(x [+ residual]) over the last axis.  x: (M, H) f32."""
    M, H = x.shape
    bm = _pick_block(M, 512, 8)
    grid = (M // bm,)
    row_spec = pl.BlockSpec((bm, H), lambda i: (i, 0))
    vec_spec = pl.BlockSpec((1, H), lambda i: (0, 0))
    if residual is None:
        kernel = functools.partial(_ln_kernel, eps=eps)
        in_specs = [row_spec, vec_spec, vec_spec]
        args = (x, gamma.reshape(1, H), beta.reshape(1, H))
    else:
        kernel = functools.partial(_add_ln_kernel, eps=eps)
        in_specs = [row_spec, row_spec, vec_spec, vec_spec]
        args = (x, residual, gamma.reshape(1, H), beta.reshape(1, H))
    return pl.pallas_call(
        kernel,
        out_shape=jax.ShapeDtypeStruct((M, H), jnp.float32),
        grid=grid,
        in_specs=in_specs,
        out_specs=row_spec,
        compiler_params=pltpu.CompilerParams(
            dimension_semantics=("parallel",),
            vmem_limit_bytes=_VMEM_LIMIT),
    )(*args)


# ----------------------------------------------------------------------------
# Attention: one grid step per batch element over the packed QKV slab.
# Head split and merge happen inside the kernel (no JAX transposes).
# ----------------------------------------------------------------------------

def _attention_kernel(qkv_ref, mask_ref, o_ref, *, num_heads, head_dim, scale):
    qkv = qkv_ref[0]                       # (S, 3H) f32
    mask = mask_ref[...]                   # (1, S) additive key mask
    hidden = num_heads * head_dim
    out_heads = []
    for h in range(num_heads):
        lo = h * head_dim
        hi = lo + head_dim
        q = qkv[:, lo:hi].astype(jnp.bfloat16)
        k = qkv[:, hidden + lo:hidden + hi].astype(jnp.bfloat16)
        v = qkv[:, 2 * hidden + lo:2 * hidden + hi].astype(jnp.bfloat16)
        s = jax.lax.dot_general(q, k, (((1,), (1,)), ((), ())),
                                preferred_element_type=jnp.float32) * scale
        s = s + mask                                    # broadcast over queries
        s_max = jnp.max(s, axis=-1, keepdims=True)
        p = jnp.exp(s - s_max)
        inv = pl.reciprocal(jnp.sum(p, axis=-1, keepdims=True), approx=True)
        p = p * inv
        out_heads.append(jnp.dot(p.astype(jnp.bfloat16), v,
                                 preferred_element_type=jnp.float32))
    o_ref[0] = jnp.concatenate(out_heads, axis=-1).astype(o_ref.dtype)


def attention(qkv, add_mask, num_heads):
    """qkv: (B, S, 3H) packed projections, add_mask: (B, S) additive mask."""
    B, S, three_h = qkv.shape
    H = three_h // 3
    D = H // num_heads
    return pl.pallas_call(
        functools.partial(_attention_kernel, num_heads=num_heads,
                          head_dim=D, scale=1.0 / math.sqrt(D)),
        out_shape=jax.ShapeDtypeStruct((B, S, H), jnp.float32),
        grid=(B,),
        in_specs=[
            pl.BlockSpec((1, S, three_h), lambda i: (i, 0, 0)),
            pl.BlockSpec((1, S), lambda i: (i, 0)),
        ],
        out_specs=pl.BlockSpec((1, S, H), lambda i: (i, 0, 0)),
        compiler_params=pltpu.CompilerParams(
            dimension_semantics=("parallel",),
            vmem_limit_bytes=_VMEM_LIMIT),
    )(qkv, add_mask)


# ----------------------------------------------------------------------------
# Parameter initialization (deterministic, BERT-style N(0, 0.02))
# Matmul weights stored in bf16; biases / LN params / embeddings in f32.
# ----------------------------------------------------------------------------

def init_bert_params(key, *, vocab, max_pos, type_vocab, hidden, layers,
                     heads, intermediate):
    def nrm(k, shape, dtype=jnp.bfloat16):
        return (0.02 * jax.random.normal(k, shape, dtype=jnp.float32)).astype(dtype)

    keys = iter(jax.random.split(key, 8 + layers * 16))
    p = {
        "num_heads": heads,
        "word_emb": nrm(next(keys), (vocab, hidden), jnp.float32),
        "pos_emb": nrm(next(keys), (max_pos, hidden), jnp.float32),
        "type_emb": nrm(next(keys), (type_vocab, hidden), jnp.float32),
        "emb_ln_g": jnp.ones((hidden,), jnp.float32),
        "emb_ln_b": jnp.zeros((hidden,), jnp.float32),
        "pool_w": nrm(next(keys), (hidden, hidden)),
        "pool_b": jnp.zeros((hidden,), jnp.float32),
        "layers": [],
    }
    for _ in range(layers):
        # Fused QKV projection weight: (H, 3H) = [q | k | v] along columns.
        qkv_w = jnp.concatenate([nrm(next(keys), (hidden, hidden)),
                                 nrm(next(keys), (hidden, hidden)),
                                 nrm(next(keys), (hidden, hidden))], axis=1)
        lyr = {
            "qkv_w": qkv_w,
            "qkv_b": jnp.zeros((3 * hidden,), jnp.float32),
            "o_w": nrm(next(keys), (hidden, hidden)),
            "o_b": jnp.zeros((hidden,), jnp.float32),
            "ln1_g": jnp.ones((hidden,), jnp.float32),
            "ln1_b": jnp.zeros((hidden,), jnp.float32),
            "i_w": nrm(next(keys), (hidden, intermediate)),
            "i_b": jnp.zeros((intermediate,), jnp.float32),
            "f_w": nrm(next(keys), (intermediate, hidden)),
            "f_b": jnp.zeros((hidden,), jnp.float32),
            "ln2_g": jnp.ones((hidden,), jnp.float32),
            "ln2_b": jnp.zeros((hidden,), jnp.float32),
        }
        p["layers"].append(lyr)
    return p


# ----------------------------------------------------------------------------
# Forward pass (BertModel semantics: last_hidden_state + pooler_output)
# ----------------------------------------------------------------------------

def bert_forward(params, input_ids, token_type_ids, attention_mask):
    B, S = input_ids.shape
    H = params["word_emb"].shape[1]
    NH = params["num_heads"]

    # Embedding gathers are glue (plain JAX); normalization is a kernel.
    emb = (params["word_emb"][input_ids]
           + params["pos_emb"][:S][None, :, :]
           + params["type_emb"][token_type_ids])
    x = emb.reshape(B * S, H).astype(jnp.float32)
    x = layernorm(x, params["emb_ln_g"], params["emb_ln_b"])

    # Extended attention mask: 0 where attended, -1e9 where padded.
    add_mask = (1.0 - attention_mask.astype(jnp.float32)) * -1e9     # (B, S)

    for lyr in params["layers"]:
        # Fused QKV projection (single GEMM).
        qkv = dense(x, lyr["qkv_w"], lyr["qkv_b"])                   # (B*S, 3H)
        ctx = attention(qkv.reshape(B, S, 3 * H), add_mask, NH)      # (B, S, H)
        attn_out = dense(ctx.reshape(B * S, H), lyr["o_w"], lyr["o_b"])
        x = layernorm(attn_out, lyr["ln1_g"], lyr["ln1_b"], residual=x)

        ffn = dense(x, lyr["i_w"], lyr["i_b"], activation="gelu")
        ffn = dense(ffn, lyr["f_w"], lyr["f_b"])
        x = layernorm(ffn, lyr["ln2_g"], lyr["ln2_b"], residual=x)

    last_hidden_state = x.reshape(B, S, H)

    # Pooler: B-row GEMM (B=2) — kernel launch + DMA overhead dominates a
    # dedicated pallas_call, so per perf review it stays in plain JAX (XLA).
    cls = last_hidden_state[:, 0, :]                                 # (B, H)
    pooler_output = jnp.tanh(
        jnp.dot(cls.astype(jnp.bfloat16), params["pool_w"],
                preferred_element_type=jnp.float32) + params["pool_b"])
    return {"last_hidden_state": last_hidden_state,
            "pooler_output": pooler_output}


# ----------------------------------------------------------------------------
# Main
# ----------------------------------------------------------------------------

if __name__ == "__main__":
    # TODO(synk): BertTokenizer (string -> ids) has no Pallas equivalent; the
    # kernel consumes pre-tokenized input_ids / token_type_ids / attention_mask.
    VOCAB, MAX_POS, TYPE_VOCAB = 64, 32, 2
    HIDDEN, LAYERS, HEADS, INTER = 32, 2, 4, 64
    B, S = 2, 8

    key = jax.random.PRNGKey(0)
    k_param, k_ids = jax.random.split(key)

    params = init_bert_params(k_param, vocab=VOCAB, max_pos=MAX_POS,
                              type_vocab=TYPE_VOCAB, hidden=HIDDEN,
                              layers=LAYERS, heads=HEADS, intermediate=INTER)

    input_ids = jax.random.randint(k_ids, (B, S), 0, VOCAB, dtype=jnp.int32)
    token_type_ids = jnp.array([[0] * S, [0] * (S // 2) + [1] * (S // 2)],
                               dtype=jnp.int32)
    attention_mask = jnp.array([[1] * S, [1] * (S - 2) + [0] * 2],
                               dtype=jnp.int32)

    out = bert_forward(params, input_ids, token_type_ids, attention_mask)
    jax.block_until_ready(out)

    assert out["last_hidden_state"].shape == (B, S, HIDDEN)
    assert out["pooler_output"].shape == (B, HIDDEN)
    assert jnp.all(jnp.isfinite(out["last_hidden_state"]))
    assert jnp.all(jnp.isfinite(out["pooler_output"]))
    print("KERNEL_OK")
</pallas_src>

<mosaic_0001>
module attributes {stable_mosaic.version = 11 : i64} {
  func.func @_ln_kernel(%arg0: i32, %arg1: memref<16x32xf32, #tpu.memory_space<vmem>>, %arg2: memref<1x32xf32, #tpu.memory_space<vmem>>, %arg3: memref<1x32xf32, #tpu.memory_space<vmem>>, %arg4: memref<16x32xf32, #tpu.memory_space<vmem>>) attributes {dimension_semantics = [#tpu.dimension_semantics<parallel>], iteration_bounds = array<i64: 1>, scalar_prefetch = 0 : i64, scratch_operands = 0 : i64, tpu.core_type = #tpu.core_type<tc>, window_params = [{transform_indices = @transform_0, window_bounds = array<i64: 16, 32>}, {pipeline_mode = #tpu.pipeline_mode<synchronous>, transform_indices = @transform_1, window_bounds = array<i64: 1, 32>}, {pipeline_mode = #tpu.pipeline_mode<synchronous>, transform_indices = @transform_2, window_bounds = array<i64: 1, 32>}, {transform_indices = @transform_3, window_bounds = array<i64: 16, 32>}]} {
    %c0 = arith.constant 0 : index
    %c0_0 = arith.constant 0 : index
    %0 = vector.load %arg1[%c0, %c0_0] : memref<16x32xf32, #tpu.memory_space<vmem>>, vector<16x32xf32>
    %c0_1 = arith.constant 0 : index
    %c0_2 = arith.constant 0 : index
    %1 = vector.load %arg2[%c0_1, %c0_2] : memref<1x32xf32, #tpu.memory_space<vmem>>, vector<1x32xf32>
    %c0_3 = arith.constant 0 : index
    %c0_4 = arith.constant 0 : index
    %2 = vector.load %arg3[%c0_3, %c0_4] : memref<1x32xf32, #tpu.memory_space<vmem>>, vector<1x32xf32>
    %cst = arith.constant dense<0.000000e+00> : vector<16xf32>
    %3 = vector.multi_reduction <add>, %0, %cst [1] : vector<16x32xf32> to vector<16xf32>
    %4 = vector.shape_cast %3 : vector<16xf32> to vector<16x1xf32>
    %cst_5 = arith.constant 3.200000e+01 : f32
    %5 = vector.broadcast %cst_5 : f32 to vector<16x1xf32>
    %6 = arith.divf %4, %5 : vector<16x1xf32>
    %7 = vector.broadcast %6 : vector<16x1xf32> to vector<16x32xf32>
    %8 = arith.subf %0, %7 : vector<16x32xf32>
    %9 = arith.mulf %8, %8 : vector<16x32xf32>
    %cst_6 = arith.constant dense<0.000000e+00> : vector<16xf32>
    %10 = vector.multi_reduction <add>, %9, %cst_6 [1] : vector<16x32xf32> to vector<16xf32>
    %11 = vector.shape_cast %10 : vector<16xf32> to vector<16x1xf32>
    %cst_7 = arith.constant 3.200000e+01 : f32
    %12 = vector.broadcast %cst_7 : f32 to vector<16x1xf32>
    %13 = arith.divf %11, %12 : vector<16x1xf32>
    %cst_8 = arith.constant 9.99999996E-13 : f32
    %14 = vector.broadcast %cst_8 : f32 to vector<16x1xf32>
    %15 = arith.addf %13, %14 : vector<16x1xf32>
    %16 = math.rsqrt %15 : vector<16x1xf32>
    %17 = vector.broadcast %16 : vector<16x1xf32> to vector<16x32xf32>
    %18 = arith.mulf %8, %17 : vector<16x32xf32>
    %19 = vector.broadcast %1 : vector<1x32xf32> to vector<16x32xf32>
    %20 = arith.mulf %18, %19 : vector<16x32xf32>
    %21 = vector.broadcast %2 : vector<1x32xf32> to vector<16x32xf32>
    %22 = arith.addf %20, %21 : vector<16x32xf32>
    %c0_9 = arith.constant 0 : index
    %c0_10 = arith.constant 0 : index
    %23 = vector.load %arg4[%c0_9, %c0_10] : memref<16x32xf32, #tpu.memory_space<vmem>>, vector<16x32xf32>
    tpu.vector_store %arg4[%c0_9, %c0_10], %22 {strides = array<i32>} : memref<16x32xf32, #tpu.memory_space<vmem>>, vector<16x32xf32>,
    return
  }
  func.func @transform_0(%arg0: i32) -> (i32, i32) {
    %c0_i32 = arith.constant 0 : i32
    %c0_i32_0 = arith.constant 0 : i32
    return %arg0, %c0_i32 : i32, i32
  }
  func.func @transform_1(%arg0: i32) -> (i32, i32) {
    %c0_i32 = arith.constant 0 : i32
    %c0_i32_0 = arith.constant 0 : i32
    %c0_i32_1 = arith.constant 0 : i32
    return %c0_i32, %c0_i32_0 : i32, i32
  }
  func.func @transform_2(%arg0: i32) -> (i32, i32) {
    %c0_i32 = arith.constant 0 : i32
    %c0_i32_0 = arith.constant 0 : i32
    %c0_i32_1 = arith.constant 0 : i32
    return %c0_i32, %c0_i32_0 : i32, i32
  }
  func.func @transform_3(%arg0: i32) -> (i32, i32) {
    %c0_i32 = arith.constant 0 : i32
    %c0_i32_0 = arith.constant 0 : i32
    return %arg0, %c0_i32 : i32, i32
  }
}

</mosaic_0001>

<bundles_post_ra>
// kernel: tpu_custom_call.1
= control target key start
LH: loop header
LB: loop body
LE: loop exit
PB: predicated region body
PF: predicated region fallthrough
CT: control target
= control target key end

     0   :  { %8 = vsyncpa [#allocation3], 0  ;;  %s220_s0 = inlined_call_operand.hbm [shape: f32[16,32], index: 0, kind: input, shape index: {}]   ;;  %s221_s1 = inlined_call_operand.vmem [shape: f32[1,32], index: 1, kind: input, shape index: {}]   ;;  %s222_s2 = inlined_call_operand.vmem [shape: f32[1,32], index: 2, kind: input, shape index: {}]   ;;  %s223_s3 = inlined_call_operand.hbm [shape: f32[16,32], index: 3, kind: output, shape index: {}]  }
   0x1   :  { %9 = vsyncpa [#allocation4], 0  ;;  %s154_s12 = smov [#allocation2]   ;;  %s106_s16 = scalar_lea.hbm %s220_s0, 256 }
   0x2   :  { %s15_s13 = sshll.u32 %s154_s12, 4  ;;  %p107_p0 = scmp.ne.s32.totalorder %s220_s0, %s106_s16  ;;  %s16_s13 = int_to_ptr.vmem [resolvable:$true] %s15_s13 }
   0x3   :  { %p110_p1 = scmp.lt.u32.totalorder %s106_s16, %s220_s0 }
   0x5   :  { %p112_p2 = pnand %p110_p1, %p107_p0 }
   0x7   :  { %115 = shalt.err (!%p112_p2)
}
   0x8   :  { %s116_s21 = scalar_lea.vmem %s16_s13, 256  ;;  %p121_p4 = scmp.lt.s32.totalorder %s16_s13, %s16_s13 }
   0x9   :  { %p117_p3 = scmp.ne.s32.totalorder %s16_s13, %s116_s21  ;;  %p122_p5 = scmp.lt.s32.totalorder %s116_s21, %s116_s21 }
   0xb   :  { %p123_p6 = por %p122_p5, %p121_p4 }
   0xd   :  { %p124_p7 = pnand %p123_p6, %p117_p3 }
   0xf   :  { %127 = shalt.err (!%p124_p7)
}
  0x10   :  { %s155_s22 = smov 128   ;;  %s156_s23 = smov 8  }
  0x11   :  { %21 = dma.hbm_to_vmem [thread:$0]  %s220_s0, 256, %s16_s13, [#allocation3], %s155_s22, %s155_s22, %s156_s23  }
  0x12   :  { %150 = dma.done.wait [#allocation3], 256  }
  0x13   :  { %151 = vsyncadd [#allocation3], 4294967040  ;;  %vm33_vm0 = vcmask 261120   ;;  %v29_v0 = vld [vmem:[#allocation2] sm:$0xff]  ;;  %v30_v1 = vld [vmem:[#allocation2 + $0x8] sm:$0xff]  ;;  %s157_s29 = smov [#allocation5]  }
  0x14   :  { %v34_v2 = vsel %vm33_vm0, %v29_v0, 0.0  ;;  %v37_v3 = vsel %vm33_vm0, %v30_v1, 0.0  ;;  %v96_v21 = vld [vmem:[%s221_s1] ss:$0 sm:$0xff]  ;;  %s84_s30 = sshll.u32 %s157_s29, 4  ;;  %s85_s30 = int_to_ptr.vmem [resolvable:$true] %s84_s30 }
  0x15   :  { %35 = vadd.xlane.f32.xlu0 %v34_v2  ;;  %v97_v23 = vld [vmem:[%s222_s2] ss:$0 sm:$0xff]  ;;  %s128_s4 = scalar_lea.vmem %s85_s30, 256  ;;  %p133_p9 = scmp.lt.s32.totalorder %s85_s30, %s85_s30 }
  0x16   :  { %p129_p8 = scmp.ne.s32.totalorder %s85_s30, %s128_s4  ;;  %p134_p10 = scmp.lt.s32.totalorder %s128_s4, %s128_s4 }
  0x18   :  { %p135_p11 = por %p134_p10, %p133_p9 }
  0x19   :  { %38 = vadd.xlane.f32.xlu0 %v37_v3 }
  0x1a   :  { %p136_p12 = pnand %p135_p11, %p129_p8 }
  0xa2   :  { %v36_v4 = vpop.xlane.xlu0 %35 }
  0xa3   :  { %v41_v5 = vmul.f32 0.03125, %v36_v4 }
  0xa5   :  { %v43_v6 = vsub.f32 %v29_v0, %v41_v5 }
  0xa6   :  { %v39_v7 = vpop.xlane.xlu0 %38 }
  0xa7   :  { %v42_v8 = vmul.f32 0.03125, %v39_v7  ;;  %v45_v9 = vmul.f32 %v43_v6, %v43_v6 }
  0xa9   :  { %v44_v10 = vsub.f32 %v30_v1, %v42_v8  ;;  %v47_v11 = vsel %vm33_vm0, %v45_v9, 0.0 }
  0xaa   :  { %48 = vadd.xlane.f32.xlu1 %v47_v11 }
  0xab   :  { %v46_v12 = vmul.f32 %v44_v10, %v44_v10 }
  0xad   :  { %v50_v13 = vsel %vm33_vm0, %v46_v12, 0.0 }
  0xae   :  { %51 = vadd.xlane.f32.xlu1 %v50_v13 }
 0x137   :  { %v49_v14 = vpop.xlane.xlu1 %48 }
 0x138   :  { %v53_v15 = vmul.f32 0.03125, %v49_v14 }
 0x13a   :  { %v55_v16 = vadd.f32 1e-12, %v53_v15 }
 0x13b   :  { %v52_v17 = vpop.xlane.xlu1 %51 }
 0x13c   :  { %102 = vrsqrt.f32 %v55_v16  ;;  %v54_v18 = vmul.f32 0.03125, %v52_v17 }
 0x13e   :  { %v56_v19 = vadd.f32 1e-12, %v54_v18 }
 0x140   :  { %104 = vrsqrt.f32 %v56_v19 }
 0x146   :  { %v103_v20 = vpop.eup %102 }
 0x147   :  { %v59_v22 = vmul.f32 %v103_v20, %v43_v6 }
 0x149   :  { %v67_v24 = vmul.f32 %v96_v21, %v59_v22 }
 0x14a   :  { %v105_v25 = vpop.eup %104 }
 0x14b   :  { %v60_v26 = vmul.f32 %v105_v25, %v44_v10  ;;  %v75_v27 = vadd.f32 %v97_v23, %v67_v24 }
 0x14d   :  { %v68_v28 = vmul.f32 %v96_v21, %v60_v26  ;;  %77 = vst.msk [vmem:[#allocation5] sm:$0xff] %vm33_vm0, %v75_v27 }
 0x14f   :  { %v76_v29 = vadd.f32 %v97_v23, %v68_v28 }
 0x151   :  { %78 = vst.msk [vmem:[#allocation5 + $0x8] sm:$0xff] %vm33_vm0, %v76_v29 }
 0x152   :  { %139 = shalt.err (!%p136_p12)
}
 0x153   :  { %s140_s5 = scalar_lea.hbm %s223_s3, 256 }
 0x154   :  { %p141_p13 = scmp.ne.s32.totalorder %s223_s3, %s140_s5  ;;  %p144_p0 = scmp.lt.u32.totalorder %s140_s5, %s223_s3 }
 0x156   :  { %p146_p1 = pnand %p144_p0, %p141_p13 }
 0x158   :  { %149 = shalt.err (!%p146_p1)
}
 0x159   :  { %90 = dma.vmem_to_hbm [thread:$0]  %s85_s30, 256, %s223_s3, [#allocation4], %s155_s22, %s155_s22, %s156_s23  }
 0x15a   :  { %152 = dma.done.wait [#allocation4], 256  }
 0x15b   :  { %153 = vsyncadd [#allocation4], 4294967040 }
 0x15c   :  { %94 = vsyncpa [#allocation3], 1 }
 0x15d   :  { %95 = vsyncpa [#allocation4], 1 }

</bundles_post_ra>
